<compile_context>
chip_gen: v7x
topology: tpu7x:2x2x1
jax: 0.10.0
libtpu: 0.0.40
codegen_flags: <defaults>
</compile_context>

<pallas_src>
import functools
import math

import jax
import jax.numpy as jnp
from jax.experimental import pallas as pl
from jax.experimental.pallas import tpu as pltpu


_LANE = 128  # TPU lane width; feature dims are padded to multiples of this.


def _round_up(x, m):
    return (x + m - 1) // m * m


def _pick_tile(total, want, quantum):
    """Largest multiple of `quantum` that divides `total` and is <= max(want, quantum)."""
    t = max(quantum, min(want, total))
    t = (t // quantum) * quantum
    while total % t != 0:
        t -= quantum
    return t


@functools.lru_cache(maxsize=1)
def _device_info():
    """(vmem_capacity_bytes, has_two_tensorcores) with safe fallbacks."""
    vmem_cap = 64 << 20          # conservative default (v7x-sized)
    two_cores = False
    try:
        vmem_cap = int(pltpu.get_tpu_info().vmem_capacity_bytes)
    except Exception:
        pass
    try:
        kind = jax.devices()[0].device_kind.lower()
        two_cores = any(t in kind for t in ("v7", "v4", "v5p"))
    except Exception:
        pass
    return vmem_cap, two_cores


# ---------------------------------------------------------------------------
# Parameter init (mirrors variance_scaling_ fan_in truncated-normal + zero bias)
# ---------------------------------------------------------------------------
def variance_scaling(key, shape, scale, dtype=jnp.float32):
    # shape is (out_dim, in_dim) like torch.nn.Linear.weight; fan_in = in_dim.
    fan_in = shape[1]
    std = math.sqrt(scale / fan_in) / 0.87962566103423978  # trunc-normal correction
    return jax.random.truncated_normal(key, -2.0, 2.0, shape, dtype) * std


def init_mlp_params(key, in_dim, init_scale, widening_factor=4):
    hid = widening_factor * in_dim
    k1, k2 = jax.random.split(key)
    w1 = variance_scaling(k1, (hid, in_dim), init_scale)   # fc1.weight (out, in)
    b1 = jnp.zeros((hid,), jnp.float32)
    w2 = variance_scaling(k2, (in_dim, hid), init_scale)   # fc2.weight (out, in)
    b2 = jnp.zeros((in_dim,), jnp.float32)
    return w1, b1, w2, b2


# ---------------------------------------------------------------------------
# One-time weight preparation (kept OUT of the per-call jitted path):
# transpose to (in, out) layout, cast to bf16 (MXU-rate operands) and zero-pad
# feature dims to multiples of 128 (lane-dense loads/stores).
# ---------------------------------------------------------------------------
def prepare_mlp_params(w1, b1, w2, b2, *, dtype=jnp.bfloat16):
    hid, in_dim = w1.shape
    in_p = _round_up(in_dim, _LANE)
    hid_p = _round_up(hid, _LANE)
    w1t = jnp.zeros((in_p, hid_p), dtype).at[:in_dim, :hid].set(w1.T.astype(dtype))
    w2t = jnp.zeros((hid_p, in_p), dtype).at[:hid, :in_dim].set(w2.T.astype(dtype))
    b1r = jnp.zeros((1, hid_p), jnp.float32).at[0, :hid].set(b1.astype(jnp.float32))
    b2r = jnp.zeros((1, in_p), jnp.float32).at[0, :in_dim].set(b2.astype(jnp.float32))
    return w1t, b1r, w2t, b2r


# ---------------------------------------------------------------------------
# Pallas kernel: fused fc1 -> tanh-GELU -> fc2 with hid-axis reduction grid.
# The accumulator is either a dedicated f32 VMEM scratch (bf16 output) or the
# resident output block itself (f32 output, no extra scratch).
# ---------------------------------------------------------------------------
def _mlp_kernel(x_ref, w1_ref, b1_ref, w2_ref, b2_ref, o_ref, *maybe_acc):
    acc_ref = maybe_acc[0] if maybe_acc else o_ref
    k = pl.program_id(1)

    @pl.when(k == 0)
    def _():
        acc_ref[...] = jnp.zeros_like(acc_ref)

    # fc1 chunk: (tm, in_p) @ (in_p, tn) -> (tm, tn); bf16 operands, f32 accumulate.
    h = jnp.dot(x_ref[...].astype(w1_ref.dtype), w1_ref[...],
                preferred_element_type=jnp.float32)
    h = h + b1_ref[...]

    # GELU(approximate='tanh') in f32:
    #   0.5 * h * (1 + tanh(sqrt(2/pi) * h * (1 + 0.044715 * h^2)))
    c = 0.7978845608028654
    h = 0.5 * h * (1.0 + jnp.tanh(c * h * (1.0 + 0.044715 * h * h)))

    # fc2 partial product over this hid chunk, accumulated in f32.
    acc_ref[...] += jnp.dot(h.astype(w2_ref.dtype), w2_ref[...],
                            preferred_element_type=jnp.float32)

    @pl.when(k == pl.num_programs(1) - 1)
    def _():
        o_ref[...] = (acc_ref[...] + b2_ref[...]).astype(o_ref.dtype)


def _vmem_bytes(tm, tn, in_p, x_bytes, w_bytes, out_bytes, use_scratch):
    """Estimate of the double-buffered VMEM resident set for one grid step."""
    b = 2 * tm * in_p * x_bytes          # x tile
    b += 2 * in_p * tn * w_bytes         # W1 hid-chunk
    b += 2 * 1 * tn * 4                  # b1 chunk
    b += 2 * tn * in_p * w_bytes         # W2 hid-chunk
    b += 2 * 1 * in_p * 4                # b2
    b += 2 * tm * in_p * out_bytes       # output tile
    if use_scratch:
        b += tm * in_p * 4               # f32 accumulator scratch
    return b


def _choose_tiles(m, in_p, hid_p, x_bytes, w_bytes, out_bytes, use_scratch, sub_q):
    vmem_cap, two_cores = _device_info()
    budget = int(vmem_cap * 0.8)                 # headroom for compiler scratch
    tm_target = 512 if vmem_cap >= (100 << 20) else 256

    # Hid tile: single reduction step for small hidden dims, else 512-wide chunks.
    tn = hid_p if hid_p <= 2048 else _pick_tile(hid_p, 512, _LANE)

    # Token tile: large, clamped to the (sublane-rounded) token count.
    tm = min(tm_target, _round_up(m, sub_q))

    # Megacore: make sure the 'parallel' token axis has >= 2 tiles on 2-TC parts.
    if two_cores and m > sub_q and pl.cdiv(m, tm) < 2:
        tm = _round_up(pl.cdiv(m, 2), sub_q)

    # Shrink until the resident set fits the VMEM budget.
    while _vmem_bytes(tm, tn, in_p, x_bytes, w_bytes, out_bytes, use_scratch) > budget:
        if tn > _LANE:
            tn = _pick_tile(hid_p, tn // 2, _LANE)
        elif tm > sub_q:
            tm = max(sub_q, _round_up(tm // 2, sub_q))
        else:
            break

    needed = _vmem_bytes(tm, tn, in_p, x_bytes, w_bytes, out_bytes, use_scratch)
    vmem_limit = int(min(vmem_cap * 0.9, max(needed * 1.25, 32 << 20)))
    return tm, tn, vmem_limit


@jax.jit
def mlp_pallas(x, w1t, b1r, w2t, b2r):
    """x: (..., in_dim). w1t/b1r/w2t/b2r from prepare_mlp_params (padded, (in,out))."""
    in_dim = x.shape[-1]
    in_p, hid_p = w1t.shape
    lead = x.shape[:-1]
    m = 1
    for d in lead:
        m *= d
    x2 = x.reshape(m, in_dim)

    x_bytes = jnp.dtype(x.dtype).itemsize
    w_bytes = jnp.dtype(w1t.dtype).itemsize
    out_bytes = x_bytes
    sub_q = 8 if x_bytes == 4 else 16              # sublane quantum per dtype
    use_scratch = x.dtype != jnp.float32           # f32 output accumulates in-place

    tm_eff, tn_eff, vmem_limit = _choose_tiles(
        m, in_p, hid_p, x_bytes, w_bytes, out_bytes, use_scratch, sub_q)
    m_pad = _round_up(m, tm_eff)

    # Zero-pad tokens / features only when actually needed (padding is a full
    # extra HBM pass over the activations). Zero rows/cols flow through as zeros.
    if m_pad != m or in_p != in_dim:
        x2 = jnp.pad(x2, ((0, m_pad - m), (0, in_p - in_dim)))

    grid = (m_pad // tm_eff, hid_p // tn_eff)
    scratch_shapes = (
        [pltpu.VMEM((tm_eff, in_p), jnp.float32)] if use_scratch else [])

    out = pl.pallas_call(
        _mlp_kernel,
        out_shape=jax.ShapeDtypeStruct((m_pad, in_p), x.dtype),
        grid_spec=pltpu.PrefetchScalarGridSpec(
            num_scalar_prefetch=0,
            grid=grid,
            in_specs=[
                pl.BlockSpec((tm_eff, in_p), lambda i, k: (i, 0)),   # x tile (resident over k)
                pl.BlockSpec((in_p, tn_eff), lambda i, k: (0, k)),   # W1^T hid-chunk
                pl.BlockSpec((1, tn_eff), lambda i, k: (0, k)),      # b1 hid-chunk
                pl.BlockSpec((tn_eff, in_p), lambda i, k: (k, 0)),   # W2^T hid-chunk
                pl.BlockSpec((1, in_p), lambda i, k: (0, 0)),        # b2 (resident)
            ],
            out_specs=pl.BlockSpec((tm_eff, in_p), lambda i, k: (i, 0)),
            scratch_shapes=scratch_shapes,
        ),
        compiler_params=pltpu.CompilerParams(
            dimension_semantics=("parallel", "arbitrary"),
            vmem_limit_bytes=vmem_limit,
        ),
    )(x2, w1t, b1r, w2t, b2r)

    return out[:m, :in_dim].reshape(*lead, in_dim)


# ---------------------------------------------------------------------------
# References for correctness checks
# ---------------------------------------------------------------------------
def mlp_ref(x, w1, b1, w2, b2):
    """Pure-f32 reference with PyTorch-layout weights."""
    h = x @ w1.T + b1
    c = 0.7978845608028654
    h = 0.5 * h * (1.0 + jnp.tanh(c * (h + 0.044715 * h ** 3)))
    return h @ w2.T + b2


def mlp_ref_prepared(x, w1t, b1r, w2t, b2r, in_dim):
    """Reference mirroring the kernel's numerics (bf16 matmul operands, f32 acc)."""
    lead = x.shape[:-1]
    xp = x.reshape(-1, in_dim)
    xp = jnp.pad(xp, ((0, 0), (0, w1t.shape[0] - in_dim)))
    h = jnp.dot(xp.astype(w1t.dtype), w1t, preferred_element_type=jnp.float32) + b1r
    c = 0.7978845608028654
    h = 0.5 * h * (1.0 + jnp.tanh(c * h * (1.0 + 0.044715 * h * h)))
    o = jnp.dot(h.astype(w2t.dtype), w2t, preferred_element_type=jnp.float32) + b2r
    return o[:, :in_dim].astype(x.dtype).reshape(*lead, in_dim)


if __name__ == "__main__":
    key = jax.random.PRNGKey(0)
    k_param, k_x = jax.random.split(key)

    batch, seq, in_dim = 2, 8, 32
    init_scale = 0.5
    widening_factor = 4

    w1, b1, w2, b2 = init_mlp_params(k_param, in_dim, init_scale, widening_factor)
    x = jax.random.normal(k_x, (batch, seq, in_dim), jnp.float32)

    # One-time weight prep (transpose + bf16 cast + lane-dense padding).
    w1t, b1r, w2t, b2r = prepare_mlp_params(w1, b1, w2, b2)
    w1t, b1r, w2t, b2r = jax.block_until_ready((w1t, b1r, w2t, b2r))

    y = mlp_pallas(x, w1t, b1r, w2t, b2r)
    y = jax.block_until_ready(y)
    assert y.shape == (batch, seq, in_dim)

    # Check 1: exact-semantics check against a reference using the same bf16
    # matmul operands / f32 accumulation as the kernel.
    y_match = mlp_ref_prepared(x, w1t, b1r, w2t, b2r, in_dim)
    assert jnp.allclose(y, y_match, atol=1e-4, rtol=1e-4), "mismatch vs bf16-matched ref"

    # Check 2: loose check against the full-f32 PyTorch-semantics reference
    # (tolerance accounts for the bf16 weight cast).
    y_f32 = mlp_ref(x, w1, b1, w2, b2)
    assert jnp.allclose(y, y_f32, atol=3e-2, rtol=3e-2), "mismatch vs f32 reference"

    print("KERNEL_OK")
</pallas_src>

<mosaic_0001>
module attributes {stable_mosaic.version = 11 : i64} {
  func.func @_mlp_kernel(%arg0: i32, %arg1: i32, %arg2: memref<16x128xf32, #tpu.memory_space<vmem>>, %arg3: memref<128x128xbf16, #tpu.memory_space<vmem>>, %arg4: memref<1x128xf32, #tpu.memory_space<vmem>>, %arg5: memref<128x128xbf16, #tpu.memory_space<vmem>>, %arg6: memref<1x128xf32, #tpu.memory_space<vmem>>, %arg7: memref<16x128xf32, #tpu.memory_space<vmem>>) attributes {dimension_semantics = [#tpu.dimension_semantics<parallel>, #tpu.dimension_semantics<arbitrary>], iteration_bounds = array<i64: 1, 1>, scalar_prefetch = 0 : i64, scratch_operands = 0 : i64, tpu.core_type = #tpu.core_type<tc>, window_params = [{transform_indices = @transform_0, window_bounds = array<i64: 16, 128>}, {transform_indices = @transform_1, window_bounds = array<i64: 128, 128>}, {transform_indices = @transform_2, window_bounds = array<i64: 1, 128>}, {transform_indices = @transform_3, window_bounds = array<i64: 128, 128>}, {pipeline_mode = #tpu.pipeline_mode<synchronous>, transform_indices = @transform_4, window_bounds = array<i64: 1, 128>}, {transform_indices = @transform_5, window_bounds = array<i64: 16, 128>}]} {
    %c0_i32 = arith.constant 0 : i32
    %0 = arith.cmpi eq, %arg1, %c0_i32 : i32
    %1 = arith.extui %0 : i1 to i32
    %c0_i32_0 = arith.constant 0 : i32
    %2 = arith.cmpi ne, %1, %c0_i32_0 : i32
    scf.if %2 {
      %cst_20 = arith.constant 0.000000e+00 : f32
      %33 = vector.broadcast %cst_20 : f32 to vector<16x128xf32>
      %c0_21 = arith.constant 0 : index
      %c0_22 = arith.constant 0 : index
      %34 = vector.load %arg7[%c0_21, %c0_22] : memref<16x128xf32, #tpu.memory_space<vmem>>, vector<16x128xf32>
      tpu.vector_store %arg7[%c0_21, %c0_22], %33 {strides = array<i32>} : memref<16x128xf32, #tpu.memory_space<vmem>>, vector<16x128xf32>,
    } else {
    }
    %c0 = arith.constant 0 : index
    %c0_1 = arith.constant 0 : index
    %3 = vector.load %arg2[%c0, %c0_1] : memref<16x128xf32, #tpu.memory_space<vmem>>, vector<16x128xf32>
    %4 = arith.truncf %3 : vector<16x128xf32> to vector<16x128xbf16>
    %c0_2 = arith.constant 0 : index
    %c0_3 = arith.constant 0 : index
    %5 = vector.load %arg3[%c0_2, %c0_3] : memref<128x128xbf16, #tpu.memory_space<vmem>>, vector<128x128xbf16>
    %cst = arith.constant dense<0.000000e+00> : vector<16x128xf32>
    %6 = tpu.matmul %4, %5, %cst {dimension_numbers = #tpu.dot_dimension_numbers<[1], [0], [0], [1], [0, 0, 1, 1], [], []>} : vector<16x128xbf16>, vector<128x128xbf16>, vector<16x128xf32> -> vector<16x128xf32>
    %c0_4 = arith.constant 0 : index
    %c0_5 = arith.constant 0 : index
    %7 = vector.load %arg4[%c0_4, %c0_5] : memref<1x128xf32, #tpu.memory_space<vmem>>, vector<1x128xf32>
    %8 = vector.broadcast %7 : vector<1x128xf32> to vector<16x128xf32>
    %9 = arith.addf %6, %8 : vector<16x128xf32>
    %cst_6 = arith.constant 5.000000e-01 : f32
    %10 = vector.broadcast %cst_6 : f32 to vector<16x128xf32>
    %11 = arith.mulf %10, %9 : vector<16x128xf32>
    %cst_7 = arith.constant 0.797884583 : f32
    %12 = vector.broadcast %cst_7 : f32 to vector<16x128xf32>
    %13 = arith.mulf %12, %9 : vector<16x128xf32>
    %cst_8 = arith.constant 4.471500e-02 : f32
    %14 = vector.broadcast %cst_8 : f32 to vector<16x128xf32>
    %15 = arith.mulf %14, %9 : vector<16x128xf32>
    %16 = arith.mulf %15, %9 : vector<16x128xf32>
    %cst_9 = arith.constant 1.000000e+00 : f32
    %17 = vector.broadcast %cst_9 : f32 to vector<16x128xf32>
    %18 = arith.addf %17, %16 : vector<16x128xf32>
    %19 = arith.mulf %13, %18 : vector<16x128xf32>
    %20 = math.tanh %19 : vector<16x128xf32>
    %cst_10 = arith.constant 1.000000e+00 : f32
    %21 = vector.broadcast %cst_10 : f32 to vector<16x128xf32>
    %22 = arith.addf %21, %20 : vector<16x128xf32>
    %23 = arith.mulf %11, %22 : vector<16x128xf32>
    %c0_11 = arith.constant 0 : index
    %c0_12 = arith.constant 0 : index
    %24 = vector.load %arg7[%c0_11, %c0_12] : memref<16x128xf32, #tpu.memory_space<vmem>>, vector<16x128xf32>
    %25 = arith.truncf %23 : vector<16x128xf32> to vector<16x128xbf16>
    %c0_13 = arith.constant 0 : index
    %c0_14 = arith.constant 0 : index
    %26 = vector.load %arg5[%c0_13, %c0_14] : memref<128x128xbf16, #tpu.memory_space<vmem>>, vector<128x128xbf16>
    %cst_15 = arith.constant dense<0.000000e+00> : vector<16x128xf32>
    %27 = tpu.matmul %25, %26, %cst_15 {dimension_numbers = #tpu.dot_dimension_numbers<[1], [0], [0], [1], [0, 0, 1, 1], [], []>} : vector<16x128xbf16>, vector<128x128xbf16>, vector<16x128xf32> -> vector<16x128xf32>
    %28 = arith.addf %24, %27 : vector<16x128xf32>
    %c0_16 = arith.constant 0 : index
    %c0_17 = arith.constant 0 : index
    %29 = vector.load %arg7[%c0_16, %c0_17] : memref<16x128xf32, #tpu.memory_space<vmem>>, vector<16x128xf32>
    tpu.vector_store %arg7[%c0_16, %c0_17], %28 {strides = array<i32>} : memref<16x128xf32, #tpu.memory_space<vmem>>, vector<16x128xf32>,
    %c0_i32_18 = arith.constant 0 : i32
    %30 = arith.cmpi eq, %arg1, %c0_i32_18 : i32
    %31 = arith.extui %30 : i1 to i32
    %c0_i32_19 = arith.constant 0 : i32
    %32 = arith.cmpi ne, %31, %c0_i32_19 : i32
    scf.if %32 {
      %c0_20 = arith.constant 0 : index
      %c0_21 = arith.constant 0 : index
      %33 = vector.load %arg7[%c0_20, %c0_21] : memref<16x128xf32, #tpu.memory_space<vmem>>, vector<16x128xf32>
      %c0_22 = arith.constant 0 : index
      %c0_23 = arith.constant 0 : index
      %34 = vector.load %arg6[%c0_22, %c0_23] : memref<1x128xf32, #tpu.memory_space<vmem>>, vector<1x128xf32>
      %35 = vector.broadcast %34 : vector<1x128xf32> to vector<16x128xf32>
      %36 = arith.addf %33, %35 : vector<16x128xf32>
      %c0_24 = arith.constant 0 : index
      %c0_25 = arith.constant 0 : index
      %37 = vector.load %arg7[%c0_24, %c0_25] : memref<16x128xf32, #tpu.memory_space<vmem>>, vector<16x128xf32>
      tpu.vector_store %arg7[%c0_24, %c0_25], %36 {strides = array<i32>} : memref<16x128xf32, #tpu.memory_space<vmem>>, vector<16x128xf32>,
    } else {
    }
    return
  }
  func.func @transform_0(%arg0: i32, %arg1: i32) -> (i32, i32) {
    %c0_i32 = arith.constant 0 : i32
    %c0_i32_0 = arith.constant 0 : i32
    return %arg0, %c0_i32 : i32, i32
  }
  func.func @transform_1(%arg0: i32, %arg1: i32) -> (i32, i32) {
    %c0_i32 = arith.constant 0 : i32
    %c0_i32_0 = arith.constant 0 : i32
    return %c0_i32, %arg1 : i32, i32
  }
  func.func @transform_2(%arg0: i32, %arg1: i32) -> (i32, i32) {
    %c0_i32 = arith.constant 0 : i32
    %c0_i32_0 = arith.constant 0 : i32
    return %c0_i32, %arg1 : i32, i32
  }
  func.func @transform_3(%arg0: i32, %arg1: i32) -> (i32, i32) {
    %c0_i32 = arith.constant 0 : i32
    %c0_i32_0 = arith.constant 0 : i32
    return %arg1, %c0_i32 : i32, i32
  }
  func.func @transform_4(%arg0: i32, %arg1: i32) -> (i32, i32) {
    %c0_i32 = arith.constant 0 : i32
    %c0_i32_0 = arith.constant 0 : i32
    %c0_i32_1 = arith.constant 0 : i32
    return %c0_i32, %c0_i32_0 : i32, i32
  }
  func.func @transform_5(%arg0: i32, %arg1: i32) -> (i32, i32) {
    %c0_i32 = arith.constant 0 : i32
    %c0_i32_0 = arith.constant 0 : i32
    return %arg0, %c0_i32 : i32, i32
  }
}

</mosaic_0001>

<bundles_post_ra>
// kernel: mlp_pallas.1
= control target key start
LH: loop header
LB: loop body
LE: loop exit
PB: predicated region body
PF: predicated region fallthrough
CT: control target
= control target key end

     0   :  { %10 = vsyncpa [#allocation3], 0  ;;  %s550_s0 = inlined_call_operand.vmem [shape: f32[16,128], index: 0, kind: input, shape index: {}]   ;;  %s551_s1 = inlined_call_operand.hbm [shape: bf16[128,128], index: 1, kind: input, shape index: {}]   ;;  %s552_s2 = inlined_call_operand.vmem [shape: f32[1,128], index: 2, kind: input, shape index: {}]   ;;  %s553_s3 = inlined_call_operand.hbm [shape: bf16[128,128], index: 3, kind: input, shape index: {}]   ;;  %s554_s4 = inlined_call_operand.vmem [shape: f32[1,128], index: 4, kind: input, shape index: {}]   ;;  %s555_s5 = inlined_call_operand.vmem [shape: f32[16,128], index: 5, kind: output, shape index: {}]  }
   0x1   :  { %11 = vsyncpa [#allocation5], 0  ;;  %s472_s18 = smov [#allocation2]   ;;  %s424_s22 = scalar_lea.hbm %s551_s1, 1024 }
   0x2   :  { %s19_s19 = sshll.u32 %s472_s18, 4  ;;  %p425_p0 = scmp.ne.s32.totalorder %s551_s1, %s424_s22  ;;  %s20_s19 = int_to_ptr.vmem [resolvable:$true] %s19_s19 }
   0x3   :  { %p428_p1 = scmp.lt.u32.totalorder %s424_s22, %s551_s1 }
   0x5   :  { %p430_p2 = pnand %p428_p1, %p425_p0 }
   0x7   :  { %433 = shalt.err (!%p430_p2)
}
   0x8   :  { %s434_s27 = scalar_lea.vmem %s20_s19, 1024  ;;  %p439_p4 = scmp.lt.s32.totalorder %s20_s19, %s20_s19 }
   0x9   :  { %p435_p3 = scmp.ne.s32.totalorder %s20_s19, %s434_s27  ;;  %p440_p5 = scmp.lt.s32.totalorder %s434_s27, %s434_s27 }
   0xb   :  { %p441_p6 = por %p440_p5, %p439_p4 }
   0xd   :  { %p442_p7 = pnand %p441_p6, %p435_p3 }
   0xf   :  { %445 = shalt.err (!%p442_p7)
}
  0x10   :  { %s473_s28 = smov 64   ;;  %s474_s29 = smov 4  }
  0x11   :  { %25 = dma.hbm_to_vmem [thread:$0]  %s551_s1, 1024, %s20_s19, [#allocation3], %s473_s28, %s473_s28, %s474_s29  }
  0x12   :  { %s475_s7 = smov [#allocation4]   ;;  %s446_s11 = scalar_lea.hbm %s553_s3, 1024 }
  0x13   :  { %s33_s8 = sshll.u32 %s475_s7, 4  ;;  %p447_p8 = scmp.ne.s32.totalorder %s553_s3, %s446_s11  ;;  %s34_s8 = int_to_ptr.vmem [resolvable:$true] %s33_s8 }
  0x14   :  { %p450_p9 = scmp.lt.u32.totalorder %s446_s11, %s553_s3 }
  0x16   :  { %p452_p10 = pnand %p450_p9, %p447_p8 }
  0x18   :  { %455 = shalt.err (!%p452_p10)
}
  0x19   :  { %s456_s16 = scalar_lea.vmem %s34_s8, 1024  ;;  %p461_p12 = scmp.lt.s32.totalorder %s34_s8, %s34_s8 }
  0x1a   :  { %p457_p11 = scmp.ne.s32.totalorder %s34_s8, %s456_s16  ;;  %p462_p13 = scmp.lt.s32.totalorder %s456_s16, %s456_s16 }
  0x1c   :  { %p463_p0 = por %p462_p13, %p461_p12 }
  0x1e   :  { %p464_p1 = pnand %p463_p0, %p457_p11 }
  0x20   :  { %467 = shalt.err (!%p464_p1)
}
  0x21   :  { %39 = dma.hbm_to_vmem [thread:$0]  %s553_s3, 1024, %s34_s8, [#allocation5], %s473_s28, %s473_s28, %s474_s29  }
  0x22   :  { %468 = dma.done.wait [#allocation3], 1024  }
  0x23   :  { %469 = vsyncadd [#allocation3], 4294966272 }
  0x24   :  { %470 = dma.done.wait [#allocation5], 1024  }
  0x25   :  { %471 = vsyncadd [#allocation5], 4294966272  ;;  %v476_v0 = vmov 0.0   ;;  %vm477_vm0 = vmmov 0   ;;  %v404_v1 = vld [vmem:[#allocation2] sm:$0xff]   ;;  %v405_v2 = vld [vmem:[#allocation2 + $0x8] sm:$0xff]  }
  0x26   :  { %358 = vmatprep.subr.bf16.mxu0 %v476_v0  ;;  %374 = vmatprep.mubr.msk.bf16.mxu0 %vm477_vm0, %v476_v0  ;;  %v406_v3 = vld [vmem:[#allocation2 + $0x10] sm:$0xff]   ;;  %v407_v4 = vld [vmem:[#allocation2 + $0x18] sm:$0xff]   ;;  %v412_v5 = vld [vmem:[#allocation4] sm:$0xff]  }
  0x27   :  { %378 = vmatprep.subr.bf16.mxu1 %v476_v0  ;;  %394 = vmatprep.mubr.msk.bf16.mxu1 %vm477_vm0, %v476_v0  ;;  %v408_v6 = vld [vmem:[#allocation2 + $0x20] sm:$0xff]   ;;  %v409_v7 = vld [vmem:[#allocation2 + $0x28] sm:$0xff]   ;;  %v410_v8 = vld [vmem:[#allocation2 + $0x30] sm:$0xff]  }
  0x28   :  { %359 = vmatpush3.bf16.msra.mxu0 %v404_v1  ;;  %379 = vmatpush3.bf16.msra.mxu1 %v412_v5  ;;  %v411_v9 = vld [vmem:[#allocation2 + $0x38] sm:$0xff]   ;;  %v55_v10 = vld [vmem:[%s550_s0] sm:$0xff]  ;;  %v56_v11 = vld [vmem:[%s550_s0 + $0x8] sm:$0xff] }
  0x29   :  { %360 = vmatprep.subr.bf16.mxu0 %v476_v0  ;;  %380 = vmatprep.subr.bf16.mxu1 %v476_v0  ;;  %v57_v12 = vpack.c.bf16 %v56_v11, %v55_v10  ;;  %v413_v13 = vld [vmem:[#allocation4 + $0x8] sm:$0xff]   ;;  %v414_v14 = vld [vmem:[#allocation4 + $0x10] sm:$0xff]   ;;  %v415_v15 = vld [vmem:[#allocation4 + $0x18] sm:$0xff]  }
  0x2a   :  { %v416_v16 = vld [vmem:[#allocation4 + $0x20] sm:$0xff]   ;;  %v417_v17 = vld [vmem:[#allocation4 + $0x28] sm:$0xff]   ;;  %v418_v18 = vld [vmem:[#allocation4 + $0x30] sm:$0xff]  }
  0x2b   :  { %v419_v19 = vld [vmem:[#allocation4 + $0x38] sm:$0xff]   ;;  %v322_v20 = vld [vmem:[%s552_s2] ss:$0 sm:$0xff] }
  0x2c   :  { %361 = vmatpush3.bf16.msra.mxu0 %v405_v2  ;;  %381 = vmatpush3.bf16.msra.mxu1 %v413_v13  ;;  %v339_v47 = vld [vmem:[%s554_s4] ss:$0 sm:$0xff] }
  0x2d   :  { %362 = vmatprep.subr.bf16.mxu0 %v476_v0  ;;  %382 = vmatprep.subr.bf16.mxu1 %v476_v0 }
  0x30   :  { %363 = vmatpush3.bf16.msra.mxu0 %v406_v3  ;;  %383 = vmatpush3.bf16.msra.mxu1 %v414_v14 }
  0x31   :  { %364 = vmatprep.subr.bf16.mxu0 %v476_v0  ;;  %384 = vmatprep.subr.bf16.mxu1 %v476_v0 }
  0x34   :  { %365 = vmatpush3.bf16.msra.mxu0 %v407_v4  ;;  %385 = vmatpush3.bf16.msra.mxu1 %v415_v15 }
  0x35   :  { %366 = vmatprep.subr.bf16.mxu0 %v476_v0  ;;  %386 = vmatprep.subr.bf16.mxu1 %v476_v0 }
  0x38   :  { %367 = vmatpush3.bf16.msra.mxu0 %v408_v6  ;;  %387 = vmatpush3.bf16.msra.mxu1 %v416_v16 }
  0x39   :  { %368 = vmatprep.subr.bf16.mxu0 %v476_v0  ;;  %388 = vmatprep.subr.bf16.mxu1 %v476_v0 }
  0x3c   :  { %369 = vmatpush3.bf16.msra.mxu0 %v409_v7  ;;  %389 = vmatpush3.bf16.msra.mxu1 %v417_v17 }
  0x3d   :  { %370 = vmatprep.subr.bf16.mxu0 %v476_v0  ;;  %390 = vmatprep.subr.bf16.mxu1 %v476_v0 }
  0x40   :  { %371 = vmatpush3.bf16.msra.mxu0 %v410_v8  ;;  %391 = vmatpush3.bf16.msra.mxu1 %v418_v18 }
  0x41   :  { %372 = vmatprep.subr.bf16.mxu0 %v476_v0  ;;  %392 = vmatprep.subr.bf16.mxu1 %v476_v0 }
  0x44   :  { %373 = vmatpush3.bf16.msra.mxu0 %v411_v9  ;;  %393 = vmatpush3.bf16.msra.mxu1 %v419_v19 }
  0x47   :  { %375 = vmatmul.mubr.bf16.vlgmr.msra.gmra.mrb[0].mxu0 %v57_v12 }
 0x11a   :  { %v163_v21 = vpop.f32.mrb[0].mxu0 }
 0x11b   :  { %v164_v22 = vadd.f32 %v322_v20, %v163_v21  ;;  %v376_v23 = vpop.f32.mrb[1].mxu0 }
 0x11c   :  { %v166_v24 = vpop.f32.mrb[2].mxu0 }
 0x11d   :  { %v174_v25 = vmul.f32 0.044715, %v164_v22  ;;  %v167_v26 = vadd.f32 %v322_v20, %v166_v24  ;;  %v377_v27 = vpop.f32.mrb[3].mxu0  ;;  %v172_v30 = vmul.f32 0.7978846, %v164_v22  ;;  %v170_v40 = vmul.f32 0.5, %v164_v22 }
 0x11f   :  { %v176_v28 = vmul.f32 %v174_v25, %v164_v22  ;;  %v175_v29 = vmul.f32 0.044715, %v167_v26  ;;  %v173_v34 = vmul.f32 0.7978846, %v167_v26  ;;  %v171_v41 = vmul.f32 0.5, %v167_v26 }
 0x121   :  { %v178_v31 = vadd.f32 1.0, %v176_v28  ;;  %v177_v32 = vmul.f32 %v175_v29, %v167_v26 }
 0x123   :  { %v180_v33 = vmul.f32 %v178_v31, %v172_v30  ;;  %v179_v35 = vadd.f32 1.0, %v177_v32 }
 0x125   :  { %v181_v36 = vmul.f32 %v179_v35, %v173_v34  ;;  %420 = vtanh.f32 %v180_v33 }
 0x127   :  { %422 = vtanh.f32 %v181_v36 }
 0x12f   :  { %v421_v37 = vpop.eup %420 }
 0x130   :  { %v184_v38 = vadd.f32 1.0, %v421_v37 }
 0x131   :  { %v423_v39 = vpop.eup %422 }
 0x132   :  { %v185_v42 = vadd.f32 1.0, %v423_v39  ;;  %v186_v43 = vmul.f32 %v184_v38, %v170_v40 }
 0x134   :  { %v187_v44 = vmul.f32 %v185_v42, %v171_v41 }
 0x136   :  { %v190_v45 = vpack.c.bf16 %v187_v44, %v186_v43 }
 0x138   :  { %395 = vmatmul.mubr.bf16.vlgmr.msra.gmra.mrb[0].mxu1 %v190_v45 }
 0x20b   :  { %v289_v46 = vpop.f32.mrb[0].mxu1 }
 0x20c   :  { %v396_v48 = vpop.f32.mrb[1].mxu1  ;;  %v312_v50 = vadd.f32 %v339_v47, %v289_v46 }
 0x20d   :  { %v292_v49 = vpop.f32.mrb[2].mxu1 }
 0x20e   :  { %v397_v51 = vpop.f32.mrb[3].mxu1  ;;  %314 = vst [vmem:[%s555_s5] sm:$0xff] %v312_v50  ;;  %v313_v52 = vadd.f32 %v339_v47, %v292_v49 }
 0x210   :  { %315 = vst [vmem:[%s555_s5 + $0x8] sm:$0xff] %v313_v52 }
 0x211   :  { %320 = vsyncpa [#allocation3], 1 }
 0x212   :  { %321 = vsyncpa [#allocation5], 1 }

</bundles_post_ra>
